<compile_context>
chip_gen: v7x
topology: tpu7x:2x2x1
jax: 0.10.0
libtpu: 0.0.40
codegen_flags: <defaults>
</compile_context>

<pallas_src>
import jax
import jax.numpy as jnp
from jax import lax
from jax.experimental import pallas as pl
from jax.experimental.pallas import tpu as pltpu

_CHUNK = 512            # lane (batch) columns per inner step -> bounds vreg pressure
_MIB = 1024 * 1024


def _coupling_kernel(u_ref, c_ref,
                     w1u_ref, w1c_ref, b1_ref,
                     w2s_ref, b2s_ref, w2t_ref, b2t_ref,
                     w_out_ref, logdet_ref):
    TB = u_ref.shape[1]
    mx = w1u_ref.dtype                       # MXU operand dtype (bf16 fast / f32 exact)

    # Resident weights/biases (tiny).
    w1u = w1u_ref[...]
    w1c = w1c_ref[...]
    b1 = b1_ref[...].astype(jnp.float32)
    w2s = w2s_ref[...]
    b2s = b2s_ref[...].astype(jnp.float32)
    w2t = w2t_ref[...]
    b2t = b2t_ref[...].astype(jnp.float32)

    def compute(u_blk, c_blk):
        u_f32 = u_blk.astype(jnp.float32)
        # Fused layer-1 of both nets, no concat: split-K accumulate on the MXU.
        # h rows 0..H-1 = scale-net hidden, rows H..2H-1 = shift-net hidden.
        h = (jnp.dot(w1u, u_blk.astype(mx), preferred_element_type=jnp.float32)
             + jnp.dot(w1c, c_blk.astype(mx), preferred_element_type=jnp.float32)
             + b1)
        h = jnp.maximum(h, 0.0).astype(mx)   # ReLU in f32, one cast for layer 2
        # Layer-2 weights are zero-padded along K -> no slicing of h needed.
        scale = jnp.tanh(jnp.dot(w2s, h, preferred_element_type=jnp.float32) + b2s)
        shift = jnp.dot(w2t, h, preferred_element_type=jnp.float32) + b2t
        w = u_f32 * jnp.exp(scale) + shift
        log_det = jnp.sum(scale, axis=0, keepdims=True)   # sublane reduce -> (1, cols)
        return w, log_det

    if TB <= _CHUNK:
        w, log_det = compute(u_ref[...], c_ref[...])
        w_out_ref[...] = w.astype(w_out_ref.dtype)
        logdet_ref[...] = log_det.astype(logdet_ref.dtype)
    else:
        n_chunks = TB // _CHUNK

        def body(i, carry):
            start = pl.multiple_of(i * _CHUNK, _CHUNK)
            cols = pl.ds(start, _CHUNK)
            w, log_det = compute(u_ref[:, cols], c_ref[:, cols])
            w_out_ref[:, cols] = w.astype(w_out_ref.dtype)
            logdet_ref[:, cols] = log_det.astype(logdet_ref.dtype)
            return carry

        lax.fori_loop(0, n_chunks, body, 0)


def _pick_batch_tile(B):
    """Largest lane-aligned (multiple-of-128) batch tile that leaves >=4 grid steps
    (2 per v7x TensorCore), falling back to >=2 steps, then a single full block."""
    candidates = (4096, 2048, 1024, 512, 256, 128)
    for min_steps in (4, 2):
        for tb in candidates:
            if B % tb == 0 and B // tb >= min_steps:
                return tb
    for tb in candidates:
        if B % tb == 0:
            return tb
    return B            # tiny/odd batch: single full-array block


def _vmem_limit_bytes(TB, D, C, H2, io_itemsize):
    io = 2 * TB * ((D + C) * io_itemsize + D * io_itemsize + 4)   # dbl-buffered streams
    weights = 2 * (H2 * (D + C) + 2 * D * H2 + H2 + 2 * D) * 4    # params (f32 upper bound)
    inter = min(TB, _CHUNK) * (H2 + 4 * D) * 4                    # live f32 intermediates
    est = io + weights + inter + 8 * _MIB                         # slack
    return int(min(max(est, 16 * _MIB), 56 * _MIB))               # < v7x 64 MiB physical


def pack_params(params, input_dim, *, compute_dtype=jnp.bfloat16):
    """One-time packing to feature-major:
      * fuse the two layer-1 Linears along output features and transpose -> (2H, D+C),
        split into a u-part (2H, D) and condition-part (2H, C);
      * transpose layer-2 weights and zero-pad along K to (D, 2H) so the kernel dots
        the fused hidden state without any lane/sublane-offset slice;
      * weights cast to the MXU compute dtype; biases stay f32 (added post-accumulation).
    """
    D = input_dim
    H = params["w1s"].shape[1]
    w1 = jnp.concatenate([params["w1s"], params["w1t"]], axis=1).T    # (2H, D+C)
    b1 = jnp.concatenate([params["b1s"], params["b1t"]], axis=1).T    # (2H, 1)
    zeros = jnp.zeros((params["w2s"].shape[1], H), params["w2s"].dtype)
    w2s = jnp.concatenate([params["w2s"].T, zeros], axis=1)           # (D, 2H)
    w2t = jnp.concatenate([zeros, params["w2t"].T], axis=1)           # (D, 2H)
    return dict(
        w1u=w1[:, :D].astype(compute_dtype),     # (2H, D)
        w1c=w1[:, D:].astype(compute_dtype),     # (2H, C)
        b1=b1.astype(jnp.float32),               # (2H, 1)
        w2s=w2s.astype(compute_dtype),           # (D, 2H)
        b2s=params["b2s"].T.astype(jnp.float32), # (D, 1)
        w2t=w2t.astype(compute_dtype),           # (D, 2H)
        b2t=params["b2t"].T.astype(jnp.float32), # (D, 1)
    )


def conditional_affine_coupling_forward(u, condition, packed, *, batch_tile=None):
    """Forward pass of ConditionalAffineCoupling.

    u:         [B, input_dim]      (f32 exact path, or bf16 fast path)
    condition: [B, condition_dim]
    packed:    dict from pack_params()
    returns (w [B, input_dim] in u.dtype, log_det [B] float32)
    """
    B, D = u.shape
    Bc, C = condition.shape
    assert Bc == B
    H2 = packed["w1u"].shape[0]                  # 2 * hidden_dim
    assert packed["w1u"].shape == (H2, D)
    assert packed["w1c"].shape == (H2, C)
    assert packed["w2s"].shape == (D, H2)
    assert packed["w2t"].shape == (D, H2)

    TB = batch_tile or _pick_batch_tile(B)
    assert B % TB == 0
    if TB > _CHUNK:
        assert TB % _CHUNK == 0, "batch tiles above the chunk size must be chunk-aligned"

    # Layout plumbing only: present feature-major [feat, batch] slabs to the kernel so
    # batch sits on the 128-lane axis. A real pipeline would keep activations
    # feature-major end-to-end and skip these transposes.
    u_fm = u.T                                   # (D, B)
    c_fm = condition.T                           # (C, B)

    grid = (B // TB,)
    full = lambda shape: pl.BlockSpec(shape, lambda i: (0, 0))   # resident params

    out_shapes = (jax.ShapeDtypeStruct((D, B), u.dtype),
                  jax.ShapeDtypeStruct((1, B), jnp.float32))

    w_fm, logdet = pl.pallas_call(
        _coupling_kernel,
        out_shape=out_shapes,
        grid_spec=pltpu.PrefetchScalarGridSpec(
            num_scalar_prefetch=0,
            grid=grid,
            in_specs=[
                pl.BlockSpec((D, TB), lambda i: (0, i)),    # u          (feature-major)
                pl.BlockSpec((C, TB), lambda i: (0, i)),    # condition
                full((H2, D)),                              # fused layer-1 W, u-part
                full((H2, C)),                              # fused layer-1 W, cond-part
                full((H2, 1)),                              # fused layer-1 b
                full((D, H2)),                              # scale layer-2 W (zero-padded K)
                full((D, 1)),                               # scale layer-2 b
                full((D, H2)),                              # shift layer-2 W (zero-padded K)
                full((D, 1)),                               # shift layer-2 b
            ],
            out_specs=[
                pl.BlockSpec((D, TB), lambda i: (0, i)),    # w         (lane-dense)
                pl.BlockSpec((1, TB), lambda i: (0, i)),    # log_det   (lane-dense slab)
            ],
        ),
        compiler_params=pltpu.CompilerParams(
            dimension_semantics=("parallel",),
            vmem_limit_bytes=_vmem_limit_bytes(
                TB, D, C, H2, jnp.dtype(u.dtype).itemsize)),
    )(u_fm, c_fm,
      packed["w1u"], packed["w1c"], packed["b1"],
      packed["w2s"], packed["b2s"], packed["w2t"], packed["b2t"])

    return w_fm.T, logdet[0]


def init_params(key, input_dim, condition_dim, hidden_dim, dtype=jnp.float32):
    """Deterministic PyTorch-Linear-style init (uniform +/- 1/sqrt(fan_in)),
    stored [in_features, out_features] so the reference does x @ W + b."""
    keys = jax.random.split(key, 8)

    def linear(kw, kb, fan_in, fan_out):
        bound = 1.0 / jnp.sqrt(fan_in)
        w = jax.random.uniform(kw, (fan_in, fan_out), dtype, -bound, bound)
        b = jax.random.uniform(kb, (1, fan_out), dtype, -bound, bound)
        return w, b

    in_dim = input_dim + condition_dim
    w1s, b1s = linear(keys[0], keys[1], in_dim, hidden_dim)
    w2s, b2s = linear(keys[2], keys[3], hidden_dim, input_dim)
    w1t, b1t = linear(keys[4], keys[5], in_dim, hidden_dim)
    w2t, b2t = linear(keys[6], keys[7], hidden_dim, input_dim)
    return dict(w1s=w1s, b1s=b1s, w2s=w2s, b2s=b2s,
                w1t=w1t, b1t=b1t, w2t=w2t, b2t=b2t)


def _reference_forward(u, condition, p):
    combined = jnp.concatenate([u, condition], axis=-1)
    h_s = jnp.maximum(combined @ p["w1s"] + p["b1s"], 0.0)
    scale = jnp.tanh(h_s @ p["w2s"] + p["b2s"])
    h_t = jnp.maximum(combined @ p["w1t"] + p["b1t"], 0.0)
    shift = h_t @ p["w2t"] + p["b2t"]
    w = u * jnp.exp(scale) + shift
    return w, scale.sum(axis=-1)


if __name__ == "__main__":
    batch, input_dim, condition_dim, hidden_dim = 256, 16, 16, 32

    key = jax.random.PRNGKey(0)
    k_u, k_c, k_p = jax.random.split(key, 3)
    u = jax.random.normal(k_u, (batch, input_dim), jnp.float32)
    condition = jax.random.normal(k_c, (batch, condition_dim), jnp.float32)
    params = init_params(k_p, input_dim, condition_dim, hidden_dim)

    w_ref, ld_ref = _reference_forward(u, condition, params)

    # 1) exactness: f32 weights + f32 I/O must match the reference tightly.
    packed_f32 = pack_params(params, input_dim, compute_dtype=jnp.float32)
    w32, ld32 = conditional_affine_coupling_forward(u, condition, packed_f32)
    jax.block_until_ready((w32, ld32))
    assert jnp.allclose(w32, w_ref, atol=1e-5, rtol=1e-5)
    assert jnp.allclose(ld32, ld_ref, atol=1e-5, rtol=1e-5)

    # 2) fast path: bf16 HBM I/O + bf16 MXU operands, f32 accumulation/elementwise.
    packed_bf16 = pack_params(params, input_dim, compute_dtype=jnp.bfloat16)
    w_bf, ld_bf = conditional_affine_coupling_forward(
        u.astype(jnp.bfloat16), condition.astype(jnp.bfloat16), packed_bf16)
    jax.block_until_ready((w_bf, ld_bf))
    assert jnp.allclose(w_bf.astype(jnp.float32), w_ref, atol=1e-1, rtol=1e-1)
    assert jnp.allclose(ld_bf, ld_ref, atol=1e-1, rtol=1e-1)

    # 3) larger batch: multi-step grid plus the in-kernel chunk loop (TB > _CHUNK).
    k_u2, k_c2 = jax.random.split(jax.random.PRNGKey(1))
    u2 = jax.random.normal(k_u2, (2048, input_dim), jnp.float32)
    c2 = jax.random.normal(k_c2, (2048, condition_dim), jnp.float32)
    w2_ref, ld2_ref = _reference_forward(u2, c2, params)
    w2, ld2 = conditional_affine_coupling_forward(u2, c2, packed_f32, batch_tile=1024)
    jax.block_until_ready((w2, ld2))
    assert jnp.allclose(w2, w2_ref, atol=1e-5, rtol=1e-5)
    assert jnp.allclose(ld2, ld2_ref, atol=1e-5, rtol=1e-5)

    print("KERNEL_OK")
</pallas_src>

<mosaic_0001>
module attributes {stable_mosaic.version = 11 : i64} {
  func.func @_coupling_kernel(%arg0: i32, %arg1: memref<16x128xf32, #tpu.memory_space<vmem>>, %arg2: memref<16x128xf32, #tpu.memory_space<vmem>>, %arg3: memref<64x16xf32, #tpu.memory_space<vmem>>, %arg4: memref<64x16xf32, #tpu.memory_space<vmem>>, %arg5: memref<64x1xf32, #tpu.memory_space<vmem>>, %arg6: memref<16x64xf32, #tpu.memory_space<vmem>>, %arg7: memref<16x1xf32, #tpu.memory_space<vmem>>, %arg8: memref<16x64xf32, #tpu.memory_space<vmem>>, %arg9: memref<16x1xf32, #tpu.memory_space<vmem>>, %arg10: memref<16x128xf32, #tpu.memory_space<vmem>>, %arg11: memref<1x128xf32, #tpu.memory_space<vmem>>) attributes {dimension_semantics = [#tpu.dimension_semantics<parallel>], iteration_bounds = array<i64: 2>, scalar_prefetch = 0 : i64, scratch_operands = 0 : i64, tpu.core_type = #tpu.core_type<tc>, window_params = [{transform_indices = @transform_0, window_bounds = array<i64: 16, 128>}, {transform_indices = @transform_1, window_bounds = array<i64: 16, 128>}, {pipeline_mode = #tpu.pipeline_mode<synchronous>, transform_indices = @transform_2, window_bounds = array<i64: 64, 16>}, {pipeline_mode = #tpu.pipeline_mode<synchronous>, transform_indices = @transform_3, window_bounds = array<i64: 64, 16>}, {pipeline_mode = #tpu.pipeline_mode<synchronous>, transform_indices = @transform_4, window_bounds = array<i64: 64, 1>}, {pipeline_mode = #tpu.pipeline_mode<synchronous>, transform_indices = @transform_5, window_bounds = array<i64: 16, 64>}, {pipeline_mode = #tpu.pipeline_mode<synchronous>, transform_indices = @transform_6, window_bounds = array<i64: 16, 1>}, {pipeline_mode = #tpu.pipeline_mode<synchronous>, transform_indices = @transform_7, window_bounds = array<i64: 16, 64>}, {pipeline_mode = #tpu.pipeline_mode<synchronous>, transform_indices = @transform_8, window_bounds = array<i64: 16, 1>}, {transform_indices = @transform_9, window_bounds = array<i64: 16, 128>}, {transform_indices = @transform_10, window_bounds = array<i64: 1, 128>}]} {
    %c0 = arith.constant 0 : index
    %c0_0 = arith.constant 0 : index
    %0 = vector.load %arg3[%c0, %c0_0] : memref<64x16xf32, #tpu.memory_space<vmem>>, vector<64x16xf32>
    %c0_1 = arith.constant 0 : index
    %c0_2 = arith.constant 0 : index
    %1 = vector.load %arg4[%c0_1, %c0_2] : memref<64x16xf32, #tpu.memory_space<vmem>>, vector<64x16xf32>
    %c0_3 = arith.constant 0 : index
    %c0_4 = arith.constant 0 : index
    %2 = vector.load %arg5[%c0_3, %c0_4] : memref<64x1xf32, #tpu.memory_space<vmem>>, vector<64x1xf32>
    %c0_5 = arith.constant 0 : index
    %c0_6 = arith.constant 0 : index
    %3 = vector.load %arg6[%c0_5, %c0_6] : memref<16x64xf32, #tpu.memory_space<vmem>>, vector<16x64xf32>
    %c0_7 = arith.constant 0 : index
    %c0_8 = arith.constant 0 : index
    %4 = vector.load %arg7[%c0_7, %c0_8] : memref<16x1xf32, #tpu.memory_space<vmem>>, vector<16x1xf32>
    %c0_9 = arith.constant 0 : index
    %c0_10 = arith.constant 0 : index
    %5 = vector.load %arg8[%c0_9, %c0_10] : memref<16x64xf32, #tpu.memory_space<vmem>>, vector<16x64xf32>
    %c0_11 = arith.constant 0 : index
    %c0_12 = arith.constant 0 : index
    %6 = vector.load %arg9[%c0_11, %c0_12] : memref<16x1xf32, #tpu.memory_space<vmem>>, vector<16x1xf32>
    %c0_13 = arith.constant 0 : index
    %c0_14 = arith.constant 0 : index
    %7 = vector.load %arg1[%c0_13, %c0_14] : memref<16x128xf32, #tpu.memory_space<vmem>>, vector<16x128xf32>
    %c0_15 = arith.constant 0 : index
    %c0_16 = arith.constant 0 : index
    %8 = vector.load %arg2[%c0_15, %c0_16] : memref<16x128xf32, #tpu.memory_space<vmem>>, vector<16x128xf32>
    %cst = arith.constant dense<0.000000e+00> : vector<64x128xf32>
    %9 = tpu.matmul %0, %7, %cst {dimension_numbers = #tpu.dot_dimension_numbers<[1], [0], [0], [1], [0, 0, 1, 1], [], []>} : vector<64x16xf32>, vector<16x128xf32>, vector<64x128xf32> -> vector<64x128xf32>
    %cst_17 = arith.constant dense<0.000000e+00> : vector<64x128xf32>
    %10 = tpu.matmul %1, %8, %cst_17 {dimension_numbers = #tpu.dot_dimension_numbers<[1], [0], [0], [1], [0, 0, 1, 1], [], []>} : vector<64x16xf32>, vector<16x128xf32>, vector<64x128xf32> -> vector<64x128xf32>
    %11 = arith.addf %9, %10 : vector<64x128xf32>
    %12 = vector.broadcast %2 : vector<64x1xf32> to vector<64x128xf32>
    %13 = arith.addf %11, %12 : vector<64x128xf32>
    %cst_18 = arith.constant 0.000000e+00 : f32
    %14 = vector.broadcast %cst_18 : f32 to vector<64x128xf32>
    %15 = arith.maximumf %13, %14 : vector<64x128xf32>
    %cst_19 = arith.constant dense<0.000000e+00> : vector<16x128xf32>
    %16 = tpu.matmul %3, %15, %cst_19 {dimension_numbers = #tpu.dot_dimension_numbers<[1], [0], [0], [1], [0, 0, 1, 1], [], []>} : vector<16x64xf32>, vector<64x128xf32>, vector<16x128xf32> -> vector<16x128xf32>
    %17 = vector.broadcast %4 : vector<16x1xf32> to vector<16x128xf32>
    %18 = arith.addf %16, %17 : vector<16x128xf32>
    %19 = math.tanh %18 : vector<16x128xf32>
    %cst_20 = arith.constant dense<0.000000e+00> : vector<16x128xf32>
    %20 = tpu.matmul %5, %15, %cst_20 {dimension_numbers = #tpu.dot_dimension_numbers<[1], [0], [0], [1], [0, 0, 1, 1], [], []>} : vector<16x64xf32>, vector<64x128xf32>, vector<16x128xf32> -> vector<16x128xf32>
    %21 = vector.broadcast %6 : vector<16x1xf32> to vector<16x128xf32>
    %22 = arith.addf %20, %21 : vector<16x128xf32>
    %23 = math.exp %19 : vector<16x128xf32>
    %24 = arith.mulf %7, %23 : vector<16x128xf32>
    %25 = arith.addf %24, %22 : vector<16x128xf32>
    %cst_21 = arith.constant dense<0.000000e+00> : vector<128xf32>
    %26 = vector.multi_reduction <add>, %19, %cst_21 [0] : vector<16x128xf32> to vector<128xf32>
    %27 = vector.shape_cast %26 : vector<128xf32> to vector<1x128xf32>
    %c0_22 = arith.constant 0 : index
    %c0_23 = arith.constant 0 : index
    %28 = vector.load %arg10[%c0_22, %c0_23] : memref<16x128xf32, #tpu.memory_space<vmem>>, vector<16x128xf32>
    tpu.vector_store %arg10[%c0_22, %c0_23], %25 {strides = array<i32>} : memref<16x128xf32, #tpu.memory_space<vmem>>, vector<16x128xf32>,
    %c0_24 = arith.constant 0 : index
    %c0_25 = arith.constant 0 : index
    %29 = vector.load %arg11[%c0_24, %c0_25] : memref<1x128xf32, #tpu.memory_space<vmem>>, vector<1x128xf32>
    tpu.vector_store %arg11[%c0_24, %c0_25], %27 {strides = array<i32>} : memref<1x128xf32, #tpu.memory_space<vmem>>, vector<1x128xf32>,
    return
  }
  func.func @transform_0(%arg0: i32) -> (i32, i32) {
    %c0_i32 = arith.constant 0 : i32
    %c0_i32_0 = arith.constant 0 : i32
    return %c0_i32, %arg0 : i32, i32
  }
  func.func @transform_1(%arg0: i32) -> (i32, i32) {
    %c0_i32 = arith.constant 0 : i32
    %c0_i32_0 = arith.constant 0 : i32
    return %c0_i32, %arg0 : i32, i32
  }
  func.func @transform_2(%arg0: i32) -> (i32, i32) {
    %c0_i32 = arith.constant 0 : i32
    %c0_i32_0 = arith.constant 0 : i32
    %c0_i32_1 = arith.constant 0 : i32
    return %c0_i32, %c0_i32_0 : i32, i32
  }
  func.func @transform_3(%arg0: i32) -> (i32, i32) {
    %c0_i32 = arith.constant 0 : i32
    %c0_i32_0 = arith.constant 0 : i32
    %c0_i32_1 = arith.constant 0 : i32
    return %c0_i32, %c0_i32_0 : i32, i32
  }
  func.func @transform_4(%arg0: i32) -> (i32, i32) {
    %c0_i32 = arith.constant 0 : i32
    %c0_i32_0 = arith.constant 0 : i32
    %c0_i32_1 = arith.constant 0 : i32
    return %c0_i32, %c0_i32_0 : i32, i32
  }
  func.func @transform_5(%arg0: i32) -> (i32, i32) {
    %c0_i32 = arith.constant 0 : i32
    %c0_i32_0 = arith.constant 0 : i32
    %c0_i32_1 = arith.constant 0 : i32
    return %c0_i32, %c0_i32_0 : i32, i32
  }
  func.func @transform_6(%arg0: i32) -> (i32, i32) {
    %c0_i32 = arith.constant 0 : i32
    %c0_i32_0 = arith.constant 0 : i32
    %c0_i32_1 = arith.constant 0 : i32
    return %c0_i32, %c0_i32_0 : i32, i32
  }
  func.func @transform_7(%arg0: i32) -> (i32, i32) {
    %c0_i32 = arith.constant 0 : i32
    %c0_i32_0 = arith.constant 0 : i32
    %c0_i32_1 = arith.constant 0 : i32
    return %c0_i32, %c0_i32_0 : i32, i32
  }
  func.func @transform_8(%arg0: i32) -> (i32, i32) {
    %c0_i32 = arith.constant 0 : i32
    %c0_i32_0 = arith.constant 0 : i32
    %c0_i32_1 = arith.constant 0 : i32
    return %c0_i32, %c0_i32_0 : i32, i32
  }
  func.func @transform_9(%arg0: i32) -> (i32, i32) {
    %c0_i32 = arith.constant 0 : i32
    %c0_i32_0 = arith.constant 0 : i32
    return %c0_i32, %arg0 : i32, i32
  }
  func.func @transform_10(%arg0: i32) -> (i32, i32) {
    %c0_i32 = arith.constant 0 : i32
    %c0_i32_0 = arith.constant 0 : i32
    return %c0_i32, %arg0 : i32, i32
  }
}

</mosaic_0001>

<bundles_post_ra>
// kernel: tpu_custom_call.1
= control target key start
LH: loop header
LB: loop body
LE: loop exit
PB: predicated region body
PF: predicated region fallthrough
CT: control target
= control target key end

     0   :  { %s1860_s0 = inlined_call_operand.vmem [shape: f32[16,256], index: 0, kind: input, shape index: {}]   ;;  %s1861_s1 = inlined_call_operand.vmem [shape: f32[16,256], index: 1, kind: input, shape index: {}]   ;;  %s1862_s2 = inlined_call_operand.vmem [shape: f32[64,16], index: 2, kind: input, shape index: {}]   ;;  %s1863_s3 = inlined_call_operand.vmem [shape: f32[64,16], index: 3, kind: input, shape index: {}]   ;;  %s1864_s4 = inlined_call_operand.vmem [shape: f32[64,1], index: 4, kind: input, shape index: {}]   ;;  %s1865_s5 = inlined_call_operand.vmem [shape: f32[16,64], index: 5, kind: input, shape index: {}]   ;;  %s1866_s6 = inlined_call_operand.vmem [shape: f32[16,1], index: 6, kind: input, shape index: {}]   ;;  %s1867_s7 = inlined_call_operand.vmem [shape: f32[16,64], index: 7, kind: input, shape index: {}]   ;;  %s1868_s8 = inlined_call_operand.vmem [shape: f32[16,1], index: 8, kind: input, shape index: {}]   ;;  %s1869_s9 = inlined_call_operand.hbm [shape: f32[16,256], index: 9, kind: output, shape index: {0}]   ;;  %s1870_s10 = inlined_call_operand.hbm [shape: f32[1,256], index: 10, kind: output, shape index: {1}]  }
   0x1   :  { %1873 = sst [smem:[#allocation12_spill]] %s1860_s0 }
   0x2   :  { %16 = vsyncpa [#allocation5], 0 }
   0x3   :  { %18 = vsyncpa [#allocation5 + $0x1], 0 }
   0x4   :  { %19 = vsyncpa [#allocation7], 0 }
   0x5   :  { %21 = vsyncpa [#allocation7 + $0x1], 0  ;;  %s1571_s13 = smov 0   ;;  %s1573_s14 = smov 0  }
   0x6   :  { %s1575_s15 = smov 0   ;;  %s1577_s16 = smov 0  }
   0x7 LB: > { %s1592_s17 = sadd.s32 4294967295, %s1508_s16   ;;  %s1162_s18 = sadd.s32 4294967294, %s1508_s16   ;;  %s1508_s16 = sphi %s1577_s16, %s1880_s16   ;;  %s1504_s15 = sphi %s1575_s15, %s1884_s15   ;;  %s1500_s14 = sphi %s1573_s14, %s1883_s14   ;;  %s1496_s13 = sphi %s1571_s13, %s1882_s13  }
   0x8   : > { %s1596_s19 = sadd.s32 1, %s1508_s16   ;;  %s34_s20 = sadd.s32 1, %s1504_s15 }
   0x9   : > { %1874 = sst [smem:[#allocation10_spill]] %s1596_s19  ;;  %s31_s21 = ssub.s32 %s1508_s16, %s1596_s19 }
   0xa   : > { %p41_p0 = scmp.ne.s32.totalorder %s1504_s15, %s1500_s14  ;;  %p32_p1 = scmp.eq.s32.totalorder %s31_s21, 0 }
   0xb   : > { %p42_p2 = scmp.eq.s32.totalorder %s1508_s16, 0  ;;  %p244_p3 = scmp.eq.s32.totalorder %s1592_s17, 1 }
   0xc   : > { %p249_p4 = scmp.ne.s32.totalorder %s1500_s14, %s1496_s13  ;;  %p250_p7 = scmp.eq.s32.totalorder %s1162_s18, 1 }
   0xd   : > { %s1608_s22 = scalar_select %p32_p1, %s1504_s15, %s34_s20  }
   0xe   : > { %p1610_p5 = por %p42_p2, %p41_p0  ;;  %p1614_p6 = por %p244_p3, %p41_p0 }
   0xf   : > { %1875 = sst [smem:[#allocation11_spill]] %s1608_s22  ;;  %p1618_p8 = por %p250_p7, %p249_p4 }
  0x10   : > { %p1164_p9 = scmp.ge.s32.totalorder %s1508_s16, 2 }
  0x12   : > { %313 = sbr.rel (%p1164_p9) target bundleno = 43 (0x2b), region = 44 }
  0x19   : > { %316 = sbr.rel (!%p1610_p5) target bundleno = 36 (0x24), region = 48  ;;  %s318_s26 = sand.u32 (%p1610_p5), 1, %s1504_s15  }
  0x1a   : > { %s1166_s27 = sshll.u32 (%p1610_p5), %s1508_s16, 3  ;;  %s1165_s28 = sshll.u32 (%p1610_p5), %s318_s26, 4 }
  0x1b   : > { %s1879_s0 = sld [smem:[#allocation12_spill]] (%p1610_p5)  ;;  %s320_s12 = scalar_lea.vmem (%p1610_p5), [#allocation2], %s1165_s28 }
  0x21   : > { %s322_s11 = scalar_lea.vmem %s1879_s0, %s1166_s27 }
  0x22   : > { %v352_v0 = vld [vmem:[%s322_s11] sm:$0xff]  ;;  %v354_v1 = vld [vmem:[%s322_s11 + $0x10] sm:$0xff] }
  0x23   : > { %353 = vst [vmem:[%s320_s12] sm:$0xff] %v352_v0  ;;  %355 = vst [vmem:[%s320_s12 + $0x8] sm:$0xff] %v354_v1 }
  0x24 PF: > { %361 = sbr.rel (!%p1610_p5) target bundleno = 43 (0x2b), region = 86  ;;  %s363_s18 = sand.u32 (%p1610_p5), 1, %s1504_s15  }
  0x25   : > { %s1168_s20 = sshll.u32 (%p1610_p5), %s1508_s16, 3  ;;  %s1167_s21 = sshll.u32 (%p1610_p5), %s363_s18, 4 }
  0x26   : > { %s367_s19 = scalar_lea.vmem (%p1610_p5), %s1861_s1, %s1168_s20  ;;  %s365_s27 = scalar_lea.vmem (%p1610_p5), [#allocation3], %s1167_s21 }
  0x27   : > { %v397_v2 = vld [vmem:[%s367_s19] sm:$0xff] (%p1610_p5)  ;;  %v399_v3 = vld [vmem:[%s367_s19 + $0x10] sm:$0xff] (%p1610_p5) }
  0x28   : > { %398 = vst [vmem:[%s365_s27] sm:$0xff] (%p1610_p5), %v397_v2  ;;  %400 = vst [vmem:[%s365_s27 + $0x8] sm:$0xff] (%p1610_p5), %v399_v3 }
  0x2b PF: > { %p1169_p10 = scmp.ge.s32.totalorder %s1508_s16, 1  ;;  %p405_p11 = scmp.lt.s32.totalorder %s1508_s16, 3 }
  0x2d   : > { %p406_p12 = pnand %p1169_p10, %p405_p11 }
  0x2e   : > { %s1642_s23 = sand.u32 (!%p406_p12), 1, %s1500_s14   ;;  %v472_v4 = vld [vmem:[%s1863_s3] sm:$0xff] (!%p406_p12)  ;;  %vm500_vm0 = vcmask (!%p406_p12), 130048   ;;  %v1510_v5 = vmov (!%p406_p12), 0   ;;  %v473_v13 = vld [vmem:[%s1863_s3 + $0x8] sm:$0xff] (!%p406_p12)  ;;  %v482_v14 = vld [vmem:[%s1864_s4 + $0x10] sm:$0xff] (!%p406_p12) }
  0x2f   : > { %409 = sbr.rel (%p406_p12) target bundleno = 587 (0x24b), region = 124  ;;  %s1648_s19 = sshll.u32 (!%p406_p12), %s1642_s23, 4  ;;  %1242 = vmatprep.mubr.msk.f32.mxu0 (!%p406_p12), %vm500_vm0, %v472_v4  ;;  %1404 = vset.pattern.permute.xlu0 (!%p406_p12), %v1510_v5  ;;  %v480_v12 = vld [vmem:[%s1864_s4] sm:$0xff] (!%p406_p12)  ;;  %v474_v15 = vld [vmem:[%s1863_s3 + $0x10] sm:$0xff] (!%p406_p12)  ;;  %v481_v16 = vld [vmem:[%s1864_s4 + $0x8] sm:$0xff] (!%p406_p12)  ;;  %vm825_vm1 = vcmask (!%p406_p12), 523264  }
  0x30   : > { %1405 = vset.pattern.permute.xlu1 (!%p406_p12), %v1510_v5  ;;  %s421_s22 = scalar_lea.vmem (!%p406_p12), [#allocation3], %s1648_s19  ;;  %s414_s30 = scalar_lea.vmem (!%p406_p12), [#allocation2], %s1648_s19  ;;  %761 = vperm.xlu0 (!%p406_p12), %1404, %v480_v12   ;;  %v483_v17 = vld [vmem:[%s1864_s4 + $0x18] sm:$0xff] (!%p406_p12)  ;;  %v476_v19 = vld [vmem:[%s1863_s3 + $0x20] sm:$0xff] (!%p406_p12)  ;;  %v485_v21 = vld [vmem:[%s1864_s4 + $0x28] sm:$0xff] (!%p406_p12) }
  0x31   : > { %v498_v6 = vld [vmem:[%s421_s22] sm:$0xff] (!%p406_p12)  ;;  %v499_v7 = vld [vmem:[%s421_s22 + $0x8] sm:$0xff] (!%p406_p12)  ;;  %771 = vperm.xlu1 (!%p406_p12), %1405, %v482_v14   ;;  %s1772_s28 = scalar_lea.vmem (!%p406_p12), [#allocation4], %s1648_s19  ;;  %s1195_s22 = sshll.u32 (!%p406_p12), %s1592_s17, 4 }
  0x32   : > { %v1653_v8 = vld [vmem:[%s414_s30] sm:$0xff] (!%p406_p12)  ;;  %v1308_v9 = vpack.c.bf16 (!%p406_p12), %v499_v7, %v498_v6  ;;  %v1655_v10 = vld [vmem:[%s414_s30 + $0x8] sm:$0xff] (!%p406_p12)  ;;  %s1035_s29 = sshll.u32 (!%p406_p12), %s1772_s28, 4  ;;  %s463_s30 = scalar_lea.vmem (!%p406_p12), [#allocation6], %s1642_s23  ;;  %s1778_s29 = int_to_ptr.vmem [resolvable:$true] %s1035_s29 }
  0x33   : > { %v1312_v11 = vpack.c.bf16 (!%p406_p12), %v1655_v10, %v1653_v8  ;;  %v475_v18 = vld [vmem:[%s1863_s3 + $0x18] sm:$0xff] (!%p406_p12)  ;;  %v484_v20 = vld [vmem:[%s1864_s4 + $0x20] sm:$0xff] (!%p406_p12)  ;;  %v477_v22 = vld [vmem:[%s1863_s3 + $0x28] sm:$0xff] (!%p406_p12)  ;;  %s1051_s11 = sshll.u32 (!%p406_p12), %s463_s30, 4  ;;  %s1194_s12 = sshll.u32 (!%p406_p12), %s1592_s17, 7  ;;  %s1786_s11 = int_to_ptr.vmem [resolvable:$true] %s1051_s11 }
  0x34   : > { %1309 = vmatprep.subr.bf16.mxu0 (!%p406_p12), %v1308_v9  ;;  %766 = vperm.xlu0 (!%p406_p12), %1404, %v481_v16   ;;  %v478_v23 = vld [vmem:[%s1863_s3 + $0x30] sm:$0xff] (!%p406_p12)  ;;  %v487_v25 = vld [vmem:[%s1864_s4 + $0x38] sm:$0xff] (!%p406_p12)  ;;  %v464_v27 = vld [vmem:[%s1862_s2] sm:$0xff] (!%p406_p12)  ;;  %s1784_s20 = scalar_lea.hbm (!%p406_p12), %s1870_s10, %s1195_s22  ;;  %s1792_s26 = scalar_lea.hbm (!%p406_p12), %s1869_s9, %s1194_s12 }
  0x35   : > { %1311 = vmatpush3.bf16.msra.mxu0 (!%p406_p12), %v1308_v9  ;;  %776 = vperm.xlu1 (!%p406_p12), %1405, %v483_v17   ;;  %v486_v24 = vld [vmem:[%s1864_s4 + $0x30] sm:$0xff] (!%p406_p12)  ;;  %v479_v26 = vld [vmem:[%s1863_s3 + $0x38] sm:$0xff] (!%p406_p12)  ;;  %v490_v28 = vld [vmem:[%s1866_s6] sm:$0xff] (!%p406_p12)  ;;  %s1024_s27 = scalar_lea.sflag (!%p406_p12), [#allocation7], %s1642_s23  ;;  %s1414_s19 = scalar_lea.vmem (!%p406_p12), %s1786_s11, 16 }
  0x36   : > { %1313 = vmatprep.subr.bf16.mxu0 %v1312_v11  ;;  %v491_v29 = vld [vmem:[%s1866_s6 + $0x8] sm:$0xff]  ;;  %v466_v31 = vld [vmem:[%s1862_s2 + $0x10] sm:$0xff]  ;;  %v494_v32 = vld [vmem:[%s1868_s8] sm:$0xff]  ;;  %p1415_p13 = scmp.ne.s32.totalorder %s1786_s11, %s1414_s19  ;;  %s1511_s22 = smov [#allocation6]  }
  0x37   : > { %v465_v30 = vld [vmem:[%s1862_s2 + $0x8] sm:$0xff]  ;;  %v467_v34 = vld [vmem:[%s1862_s2 + $0x18] sm:$0xff]  ;;  %v468_v35 = vld [vmem:[%s1862_s2 + $0x20] sm:$0xff]  ;;  %s1418_s18 = sshll.u32 %s1511_s22, 4  ;;  %s1419_s18 = int_to_ptr.vmem [resolvable:$false] %s1418_s18 }
  0x38   : > { %1243 = vmatmul.mubr.msk.f32.vlgmr.msra.gmra.mrb[0].mxu0 %vm500_vm0, %v473_v13  ;;  %781 = vperm.xlu0 %1404, %v484_v20   ;;  %v495_v33 = vld [vmem:[%s1868_s8 + $0x8] sm:$0xff]  ;;  %v470_v37 = vld [vmem:[%s1862_s2 + $0x30] sm:$0xff]  ;;  %v471_v38 = vld [vmem:[%s1862_s2 + $0x38] sm:$0xff]  ;;  %p1416_p0 = pnand %p1415_p13, %p1614_p6  ;;  %s1420_s0 = scalar_lea.vmem %s1419_s18, 32 }
  0x39   : > { %1315 = vmatpush3.bf16.msra.mxu0 %v1312_v11  ;;  %1245 = vmatprep.mubr.msk.f32.mxu0 %vm500_vm0, %v474_v15  ;;  %v469_v36 = vld [vmem:[%s1862_s2 + $0x28] sm:$0xff]  ;;  %v488_v39 = vld [vmem:[%s1865_s5] sm:$0xff]  ;;  %p1421_p2 = scmp.lt.s32.totalorder %s1786_s11, %s1419_s18  ;;  %p1422_p3 = scmp.lt.s32.totalorder %s1420_s0, %s1414_s19 }
  0x3a   : > { %786 = vperm.xlu1 %1405, %v485_v21   ;;  %1286 = vmatprep.mubr.msk.f32.mxu1 %vm825_vm1, %v488_v39  ;;  %v489_v14 = vld [vmem:[%s1865_s5 + $0x8] sm:$0xff]  ;;  %v492_v15 = vld [vmem:[%s1867_s7] sm:$0xff]  ;;  %p1417_p1 = pneg %p1416_p0 }
  0x3b   : > { %v493_v16 = vld [vmem:[%s1867_s7 + $0x8] sm:$0xff]  ;;  %p1423_p4 = por %p1422_p3, %p1421_p2 }
  0x3c   : > { %1246 = vmatmul.mubr.msk.f32.gmra.mrb[2].mxu0 %vm500_vm0, %v475_v18  ;;  %791 = vperm.xlu0 %1404, %v486_v24  }
  0x3d   : > { %1248 = vmatprep.mubr.msk.f32.mxu0 %vm500_vm0, %v476_v19  ;;  %p1424_p5 = pnand %p1423_p4, %p1417_p1 }
  0x3e   : > { %796 = vperm.xlu1 %1405, %v487_v25  }
  0x40   : > { %1249 = vmatmul.mubr.msk.f32.gmra.mrb[4].mxu0 %vm500_vm0, %v477_v22  ;;  %817 = vperm.xlu0 %1404, %v490_v28  }
  0x41   : > { %1251 = vmatprep.mubr.msk.f32.mxu0 %vm500_vm0, %v478_v23 }
  0x42   : > { %822 = vperm.xlu1 %1405, %v491_v29  }
  0x44   : > { %1252 = vmatmul.mubr.msk.f32.gmra.mrb[6].mxu0 %vm500_vm0, %v479_v26  ;;  %911 = vperm.xlu0 %1404, %v494_v32  }
  0x45   : > { %1258 = vmatprep.mubr.msk.f32.mxu0 %vm500_vm0, %v464_v27 }
  0x46   : > { %916 = vperm.xlu1 %1405, %v495_v33  }
  0x48   : > { %1259 = vmatmul.mubr.msk.f32.vlgmr.msra.gmra.mrb[0].mxu0 %vm500_vm0, %v465_v30 }
  0x49   : > { %1261 = vmatprep.mubr.msk.f32.mxu0 %vm500_vm0, %v466_v31 }
  0x4c   : > { %1262 = vmatmul.mubr.msk.f32.gmra.mrb[2].mxu0 %vm500_vm0, %v467_v34 }
  0x4d   : > { %1264 = vmatprep.mubr.msk.f32.mxu0 %vm500_vm0, %v468_v35 }
  0x50   : > { %1265 = vmatmul.mubr.msk.f32.gmra.mrb[4].mxu0 %vm500_vm0, %v469_v36 }
  0x51   : > { %1267 = vmatprep.mubr.msk.f32.mxu0 %vm500_vm0, %v470_v37 }
  0x54   : > { %1268 = vmatmul.mubr.msk.f32.gmra.mrb[6].mxu0 %vm500_vm0, %v471_v38 }
  0xaf   : > { %v762_v40 = vpop.permute.xlu0 %761 }
  0xb0   : > { %v772_v41 = vpop.permute.xlu1 %771 }
  0xb3   : > { %v767_v42 = vpop.permute.xlu0 %766 }
  0xb4   : > { %v777_v43 = vpop.permute.xlu1 %776 }
  0xb7   : > { %v782_v56 = vpop.permute.xlu0 %781 }
  0xb9   : > { %v787_v53 = vpop.permute.xlu1 %786 }
  0xbb   : > { %v792_v4 = vpop.permute.xlu0 %791 }
  0xbd   : > { %v797_v1 = vpop.permute.xlu1 %796 }
  0xbf   : > { %v818_v19 = vpop.permute.xlu0 %817 }
  0xc1   : > { %v823_v17 = vpop.permute.xlu1 %822 }
  0xc3   : > { %v912_v38 = vpop.permute.xlu0 %911 }
  0xc5   : > { %v917_v36 = vpop.permute.xlu1 %916 }
 0x11b   : > { %v1260_v44 = vpop.f32.mrb[0].mxu0 }
 0x11c   : > { %v800_v45 = vadd.f32 %v1260_v44, %v767_v42  ;;  %v720_v46 = vpop.f32.mrb[1].mxu0 }
 0x11d   : > { %v799_v47 = vadd.f32 %v762_v40, %v720_v46 }
 0x11e   : > { %v808_v48 = vmax.f32 %v800_v45, 0.0 }
 0x11f   : > { %v807_v49 = vmax.f32 %v799_v47, 0.0  ;;  %v1263_v50 = vpop.f32.mrb[2].mxu0 }
 0x120   : > { %v802_v51 = vadd.f32 %v1263_v50, %v777_v43  ;;  %v730_v52 = vpop.f32.mrb[3].mxu0 }
 0x121   : > { %v1316_v54 = vpack.c.bf16 %v808_v48, %v807_v49  ;;  %v801_v55 = vadd.f32 %v772_v41, %v730_v52 }
 0x122   : > { %v810_v57 = vmax.f32 %v802_v51, 0.0 }
 0x123   : > { %v809_v58 = vmax.f32 %v801_v55, 0.0  ;;  %v1266_v59 = vpop.f32.mrb[4].mxu0  ;;  %1317 = vmatprep.subr.bf16.mxu1 %v1316_v54 }
 0x124   : > { %v804_v60 = vadd.f32 %v1266_v59, %v787_v53  ;;  %v740_v61 = vpop.f32.mrb[5].mxu0  ;;  %1319 = vmatpush3.bf16.msra.mxu1 %v1316_v54 }
 0x125   : > { %v1320_v62 = vpack.c.bf16 %v810_v57, %v809_v58  ;;  %v803_v63 = vadd.f32 %v782_v56, %v740_v61 }
 0x126   : > { %v812_v0 = vmax.f32 %v804_v60, 0.0 }
 0x127   : > { %v811_v2 = vmax.f32 %v803_v63, 0.0  ;;  %v1269_v3 = vpop.f32.mrb[6].mxu0  ;;  %1321 = vmatprep.subr.bf16.mxu1 %v1320_v62 }
 0x128   : > { %v806_v5 = vadd.f32 %v1269_v3, %v797_v1  ;;  %v750_v6 = vpop.f32.mrb[7].mxu0  ;;  %1323 = vmatpush3.bf16.msra.mxu1 %v1320_v62 }
 0x129   : > { %v1324_v7 = vpack.c.bf16 %v812_v0, %v811_v2  ;;  %v805_v9 = vadd.f32 %v792_v4, %v750_v6 }
 0x12a   : > { %v814_v11 = vmax.f32 %v806_v5, 0.0 }
 0x12b   : > { %v813_v12 = vmax.f32 %v805_v9, 0.0  ;;  %1325 = vmatprep.subr.bf16.mxu1 %v1324_v7 }
 0x12c   : > { %1327 = vmatpush3.bf16.msra.mxu1 %v1324_v7 }
 0x12d   : > { %v1328_v13 = vpack.c.bf16 %v814_v11, %v813_v12 }
 0x12f   : > { %1329 = vmatprep.subr.bf16.mxu1 %v1328_v13 }
 0x130   : > { %1331 = vmatpush3.bf16.msra.mxu1 %v1328_v13 }
 0x131   : > { %1333 = vmatprep.subr.bf16.mxu1 %v1316_v54 }
 0x133   : > { %1287 = vmatmul.mubr.msk.f32.vlgmr.msra.gmra.mrb[0].mxu1 %vm825_vm1, %v489_v14 }
 0x134   : > { %1335 = vmatpush3.bf16.msra.mxu1 %v1316_v54  ;;  %1305 = vmatprep.mubr.msk.f32.mxu1 %vm825_vm1, %v492_v15 }
 0x135   : > { %1337 = vmatprep.subr.bf16.mxu1 %v1320_v62 }
 0x138   : > { %1339 = vmatpush3.bf16.msra.mxu1 %v1320_v62 }
 0x139   : > { %1341 = vmatprep.subr.bf16.mxu1 %v1324_v7 }
 0x13c   : > { %1343 = vmatpush3.bf16.msra.mxu1 %v1324_v7 }
 0x13d   : > { %1345 = vmatprep.subr.bf16.mxu1 %v1328_v13 }
 0x140   : > { %1347 = vmatpush3.bf16.msra.mxu1 %v1328_v13 }
 0x143   : > { %1306 = vmatmul.mubr.msk.f32.vlgmr.msra.gmra.mrb[2].mxu1 %vm825_vm1, %v493_v16 }
 0x206   : > { %v1288_v18 = vpop.f32.mrb[0].mxu1 }
 0x207   : > { %v904_v20 = vadd.f32 %v1288_v18, %v823_v17  ;;  %v898_v21 = vpop.f32.mrb[1].mxu1 }
 0x208   : > { %v899_v22 = vadd.f32 %v898_v21, %v818_v19 }
 0x209   : > { %1406 = vtanh.f32 %v904_v20 }
 0x20a   : > { %1408 = vtanh.f32 %v899_v22 }
 0x213   : > { %v1407_v23 = vpop.eup %1406 }
 0x214   : > { %v1409_v24 = vpop.eup %1408  ;;  %v1002_v25 = vmul.f32 1.442695, %v1407_v23 }
 0x215   : > { %v1000_v26 = vmul.f32 1.442695, %v1409_v24  ;;  %v1008_v27 = vadd.f32 %v1409_v24, %v1407_v23 }
 0x216   : > { %1410 = vpow2.f32 %v1002_v25  ;;  %v1307_v28 = vpop.f32.mrb[2].mxu1 }
 0x217   : > { %1412 = vpow2.f32 %v1000_v26  ;;  %v991_v29 = vpop.f32.mrb[3].mxu1  ;;  %v1009_v30 = vrot.slane %v1008_v27, 4  ;;  %v997_v39 = vadd.f32 %v1307_v28, %v917_v36 }
 0x218   : > { %v992_v42 = vadd.f32 %v991_v29, %v912_v38 }
 0x219   : > { %v1010_v31 = vadd.f32 %v1009_v30, %v1008_v27 }
 0x21b   : > { %v1011_v32 = vrot.slane %v1010_v31, 2 }
 0x21d   : > { %v1012_v33 = vadd.f32 %v1011_v32, %v1010_v31 }
 0x21f   : > { %v1013_v34 = vrot.slane %v1012_v33, 1 }
 0x220   : > { %v1411_v35 = vpop.eup %1410 }
 0x221   : > { %v1413_v37 = vpop.eup %1412  ;;  %v1005_v40 = vmul.f32 %v1411_v35, %v1655_v10  ;;  %v1014_v41 = vadd.f32 %v1013_v34, %v1012_v33 }
 0x222   : > { %v1004_v43 = vmul.f32 %v1413_v37, %v1653_v8 }
 0x223   : > { %v1007_v10 = vadd.f32 %v1005_v40, %v997_v39  ;;  %1017 = vst [vmem:[%s463_s30] sm:$0x1] %v1014_v41 }
 0x224   : > { %v1006_v44 = vadd.f32 %v1004_v43, %v992_v42 }
 0x225   : > { %1427 = shalt.err (!%p1424_p5)
}
 0x226   : > { %s1428_s30 = scalar_lea.hbm %s1784_s20, 16  ;;  %s1432_s21 = scalar_lea.hbm %s1870_s10, 32 }
 0x227   : > { %p1429_p7 = scmp.ne.s32.totalorder %s1784_s20, %s1428_s30  ;;  %p1433_p12 = scmp.lt.u32.totalorder %s1784_s20, %s1870_s10 }
 0x228   : > { %p1434_p13 = scmp.lt.u32.totalorder %s1432_s21, %s1428_s30  ;;  %p1436_p1 = scmp.lt.u32.totalorder %s1428_s30, %s1784_s20 }
 0x229   : > { %p1430_p10 = pnand %p1429_p7, %p1614_p6 }
 0x22a   : > { %p1435_p0 = por %p1434_p13, %p1433_p12 }
 0x22b   : > { %p1431_p11 = pneg %p1430_p10 }
 0x22c   : > { %p1437_p2 = por %p1436_p1, %p1435_p0 }
 0x22e   : > { %p1438_p3 = pnand %p1437_p2, %p1431_p11 }
 0x230   : > { %1441 = shalt.err (!%p1438_p3)
}
 0x231   : > { %1357 = dma.vmem_to_hbm [thread:$0]  (%p1614_p6), %s1786_s11, 16, %s1784_s20, %s1024_s27   ;;  %1016 = vst [vmem:[%s1772_s28 + $0x8] sm:$0xff] %v1007_v10  ;;  %1015 = vst [vmem:[%s1772_s28] sm:$0xff] %v1006_v44 }
 0x232   : > { %s1019_s0 = scalar_lea.sflag [#allocation5], %s1642_s23  ;;  %s1442_s19 = scalar_lea.vmem %s1778_s29, 256 }
 0x233   : > { %p1443_p4 = scmp.ne.s32.totalorder %s1778_s29, %s1442_s19  ;;  %s1512_s30 = smov [#allocation4]  }
 0x234   : > { %s1446_s12 = sshll.u32 %s1512_s30, 4  ;;  %s1447_s12 = int_to_ptr.vmem [resolvable:$false] %s1446_s12 }
 0x235   : > { %p1444_p5 = pnand %p1443_p4, %p1614_p6  ;;  %s1448_s17 = scalar_lea.vmem %s1447_s12, 512 }
 0x236   : > { %p1449_p10 = scmp.lt.s32.totalorder %s1778_s29, %s1447_s12  ;;  %p1450_p11 = scmp.lt.s32.totalorder %s1448_s17, %s1442_s19 }
 0x237   : > { %p1445_p7 = pneg %p1444_p5 }
 0x238   : > { %p1451_p12 = por %p1450_p11, %p1449_p10 }
 0x23a   : > { %p1452_p13 = pnand %p1451_p12, %p1445_p7 }
 0x23c   : > { %1455 = shalt.err (!%p1452_p13)
}
 0x23d   : > { %s1456_s28 = scalar_lea.hbm %s1792_s26, 256  ;;  %s1460_s27 = scalar_lea.hbm %s1869_s9, 512 }
 0x23e   : > { %p1457_p0 = scmp.ne.s32.totalorder %s1792_s26, %s1456_s28  ;;  %p1461_p3 = scmp.lt.u32.totalorder %s1792_s26, %s1869_s9 }
 0x23f   : > { %p1462_p4 = scmp.lt.u32.totalorder %s1460_s27, %s1456_s28  ;;  %p1464_p7 = scmp.lt.u32.totalorder %s1456_s28, %s1792_s26 }
 0x240   : > { %p1458_p1 = pnand %p1457_p0, %p1614_p6 }
 0x241   : > { %p1463_p5 = por %p1462_p4, %p1461_p3 }
 0x242   : > { %p1459_p2 = pneg %p1458_p1 }
 0x243   : > { %p1465_p10 = por %p1464_p7, %p1463_p5 }
 0x245   : > { %p1466_p11 = pnand %p1465_p10, %p1459_p2 }
 0x247   : > { %1469 = shalt.err (!%p1466_p11)
}
 0x248   : > { %s1513_s18 = smov 128   ;;  %s1514_s19 = smov 256  }
 0x249   : > { %s1515_s30 = smov 8  }
 0x24a   : > { %1356 = dma.vmem_to_hbm [thread:$0]  (%p1614_p6), %s1778_s29, 256, %s1792_s26, %s1019_s0, %s1513_s18, %s1514_s19, %s1515_s30  }
 0x24b PF: > { %s1063_s12 = sand.u32 1, %s1496_s13   ;;  %p1361_p12 = pnand %p1164_p9, %p1618_p8 }
 0x24c   : > { %s1064_s17 = scalar_lea.sflag [#allocation5], %s1063_s12 }
 0x24d   : > { %1487 = dma.done.wait (!%p1361_p12), %s1064_s17, 256  }
 0x24e   : > { %1489 = vsyncadd (!%p1361_p12), %s1064_s17, 4294967040  ;;  %s1073_s28 = scalar_lea.sflag [#allocation7], %s1063_s12 }
 0x24f   : > { %1491 = dma.done.wait (!%p1361_p12), %s1073_s28, 16  }
 0x250   : > { %1493 = vsyncadd (!%p1361_p12), %s1073_s28, 4294967280  ;;  %s1880_s16 = sld [smem:[#allocation10_spill]]  ;;  %s1881_s24 = sld [smem:[#allocation11_spill]] }
 0x251   : > { %s1882_s13 = smov %s1500_s14  ;;  %s1883_s14 = smov %s1504_s15 }
 0x256   : > { %p24_p6 = scmp.ge.s32.totalorder %s1880_s16, 4   ;;  %s1884_s15 = smov %s1881_s24 }
 0x258   :  { %26 = sbr.rel (!%p24_p6) target bundleno = 7 (0x7), region = 197 }
 0x25f   :  { %1077 = vsyncpa [#allocation5], 1 }
 0x260   :  { %1079 = vsyncpa [#allocation5 + $0x1], 1 }
 0x261   :  { %1080 = vsyncpa [#allocation7], 1 }
 0x262   :  { %1082 = vsyncpa [#allocation7 + $0x1], 1 }

</bundles_post_ra>
